<compile_context>
chip_gen: v7x
topology: tpu7x:2x2x1
jax: 0.10.0
libtpu: 0.0.40
codegen_flags: <defaults>
</compile_context>

<pallas_src>
from functools import partial

import jax
import jax.numpy as jnp
import numpy as np
from jax.experimental import pallas as pl
from jax.experimental.pallas import tpu as pltpu


# --------------------------------------------------------------------------- #
# Generation-aware VMEM budget
# --------------------------------------------------------------------------- #

def _vmem_limit_bytes():
    try:
        cap = int(pltpu.get_tpu_info().vmem_capacity_bytes)
    except Exception:
        cap = 64 * 1024 * 1024                     # conservative (v7x-sized) fallback
    # ~25% headroom for Mosaic-internal scratch: 96 MiB on v5e/v6e, 48 MiB on v7x.
    return min((cap * 3) // 4, 100 * 1024 * 1024)


_VMEM_LIMIT = _vmem_limit_bytes()
_TILE_BUDGET = (_VMEM_LIMIT * 7) // 10             # footprint budget for picked tiles


# --------------------------------------------------------------------------- #
# pl.Buffered(1) capability probe (single-buffered resident weights)
# --------------------------------------------------------------------------- #

_SINGLE_BUFFER_OK = None


def _single_buffer_supported():
    global _SINGLE_BUFFER_OK
    if _SINGLE_BUFFER_OK is None:
        def _copy(x_ref, o_ref):
            o_ref[...] = x_ref[...]
        try:
            x = jnp.arange(8 * 128, dtype=jnp.float32).reshape(8, 128)
            y = pl.pallas_call(
                _copy,
                out_shape=jax.ShapeDtypeStruct((8, 128), jnp.float32),
                grid=(2,),
                in_specs=[pl.BlockSpec((8, 128), lambda i: (0, 0),
                                       pipeline_mode=pl.Buffered(1))],
                out_specs=pl.BlockSpec((8, 128), lambda i: (0, 0)),
            )(x)
            np.testing.assert_allclose(np.asarray(y), np.asarray(x))
            _SINGLE_BUFFER_OK = True
        except Exception:
            _SINGLE_BUFFER_OK = False
    return _SINGLE_BUFFER_OK


# --------------------------------------------------------------------------- #
# Tile pickers (account for everything resident in VMEM)
# --------------------------------------------------------------------------- #

def _sublane_pack(itemsize):
    return max(8, 32 // int(itemsize))


def _conv_footprint(TH, Wh, Wo, C, Cout, cds, ods, weight_buffers):
    main = 2 * (4 * TH * Wh * C) * cds             # (1,2,2,TH,Wh,C), double-buffered
    halo = 2 * (2 * Wh * C) * cds                  # (1,1,2,1,Wh,C), double-buffered
    wgt = weight_buffers * 9 * C * Cout * cds      # resident weights
    bias = 2 * max(Cout, 128) * 4
    outb = 2 * TH * Wo * Cout * ods                # output block, double-buffered
    acc = TH * Wo * Cout * 4                       # f32 accumulator value
    tmp = 2 * TH * Wh * C * cds + TH * Wo * C * cds  # shifted-row concat + tap temp
    return main + halo + wgt + bias + outb + acc + tmp


def _pick_conv_row_tile(N, Ho, Wh, Wo, C, Cout, cds, ods, weight_buffers,
                        budget=None):
    budget = _TILE_BUDGET if budget is None else budget
    sub = _sublane_pack(ods)
    valid = [d for d in range(Ho, 0, -1)
             if Ho % d == 0 and ((d * Wo) % sub == 0 or d == Ho)]
    fitting = [d for d in valid
               if _conv_footprint(d, Wh, Wo, C, Cout, cds, ods,
                                  weight_buffers) <= budget]
    cands = fitting if fitting else valid[-1:]
    # keep >=2 grid points so both TensorCores of a v7x chip get work
    multi = [d for d in cands if N * (Ho // d) >= 2]
    return (multi if multi else cands)[0]
    # TODO(synk): support a ragged last row tile so a prime Ho does not fall
    # back to TH == 1 (halo becomes 50% extra traffic there).


def _pool_footprint(TC, THo, Wi, Wo, ds):
    inb = 2 * TC * THo * 2 * Wi * ds
    outb = 2 * TC * THo * Wo * ds
    pmat = 2 * Wi * Wo * ds
    tmp = TC * THo * (Wi * ds + Wo * 4)            # pre-summed rows + f32 result
    return inb + outb + pmat + tmp


def _pick_pool_tiles(N, C, Ho, Wi, Wo, ds, budget=None):
    budget = _TILE_BUDGET if budget is None else budget
    sub = _sublane_pack(ds)
    row_valid = [d for d in range(Ho, 0, -1)
                 if Ho % d == 0 and (d % sub == 0 or d == Ho)]
    THo = next((d for d in row_valid
                if _pool_footprint(1, d, Wi, Wo, ds) <= budget), row_valid[-1])
    chan_valid = [d for d in range(C, 0, -1) if C % d == 0]
    TC = next((d for d in chan_valid
               if _pool_footprint(d, THo, Wi, Wo, ds) <= budget), 1)
    # keep >=2 grid points (v7x has 2 TensorCores per chip)
    if N * (C // TC) * (Ho // THo) < 2:
        smaller_c = [d for d in chan_valid if d <= C // 2]
        smaller_r = [d for d in row_valid if d <= Ho // 2]
        if smaller_c:
            TC = smaller_c[0]
        elif smaller_r:
            THo = smaller_r[0]
    return TC, THo


# --------------------------------------------------------------------------- #
# Kernels
# --------------------------------------------------------------------------- #

def _conv_down_kernel(xm_ref, xh_ref, w_ref, b_ref, o_ref):
    """3x3 / stride-2 conv on the (0,1,0,1)-padded input, one output row tile.

    xm_ref: (1, 2, 2, TH, Wh, C)  phase-split rows [t*TH, t*TH+TH)
            x_pad[n, c, 2*hh+rh, 2*ww+rw] == xm[n, rh, rw, hh, ww, c]
    xh_ref: (1, 1, 2, 1, Wh, C)   halo: row phase 0, coarse row t*TH+TH
    w_ref : (9, C, Cout)          tap-major weights (kh*3+kw), resident
    b_ref : (1, Cout)             f32 bias, resident
    o_ref : (1, TH*Wo, Cout)      flattened (row-major) output rows of the tile
    """
    _, _, _, TH, Wh, C = xm_ref.shape
    Wo = Wh - 1
    M = TH * Wo

    acc = b_ref[...].astype(jnp.float32)           # (1, Cout) -> broadcasts below

    # taps kh in {0,1}: coarse row = t*TH + ho, row phase rh == kh
    for kh in range(2):
        for kw in range(3):
            rw, pw = kw % 2, kw // 2
            tap = xm_ref[0, kh, rw, :, pw:pw + Wo, :].reshape(M, C)
            acc = acc + jnp.dot(tap, w_ref[3 * kh + kw],
                                preferred_element_type=jnp.float32)

    # taps kh == 2: coarse row = t*TH + ho + 1 (row phase 0); the last output
    # row of the tile needs the halo row t*TH+TH.
    if TH > 1:
        shifted = jnp.concatenate(
            [xm_ref[0, 0, :, 1:TH, :, :], xh_ref[0, 0]], axis=1)   # (2, TH, Wh, C)
    else:
        shifted = xh_ref[0, 0]                                     # (2, 1, Wh, C)
    for kw in range(3):
        rw, pw = kw % 2, kw // 2
        tap = shifted[rw, :, pw:pw + Wo, :].reshape(M, C)
        acc = acc + jnp.dot(tap, w_ref[6 + kw],
                            preferred_element_type=jnp.float32)

    o_ref[0] = acc.astype(o_ref.dtype)


def _avg_pool_kernel(x_ref, p_ref, o_ref):
    """2x2 / stride-2 average pool on one (channel, row) tile.

    x_ref: (1, TC, THo, 2*Wi)  each packed row is [input row 2*ho ; row 2*ho+1]
    p_ref: (Wi, Wo)            0 / 0.25 width-pooling matrix (resident)
    o_ref: (1, TC, THo, Wo)
    """
    _, TC, THo, Wi2 = x_ref.shape
    Wi = Wi2 // 2
    Wo = o_ref.shape[-1]
    x2 = x_ref[0].reshape(TC * THo, Wi2)
    rows = x2[:, :Wi] + x2[:, Wi:]                 # pre-sum the two row phases (VPU)
    y = jnp.dot(rows, p_ref[...], preferred_element_type=jnp.float32)
    o_ref[0] = y.reshape(TC, THo, Wo).astype(o_ref.dtype)


# --------------------------------------------------------------------------- #
# Wrappers
# --------------------------------------------------------------------------- #

@partial(jax.jit, static_argnames=("row_tile", "compute_dtype", "weight_buffers",
                                   "channels_last_out"))
def _downsample_conv_impl(x_nchw, weight_oihw, bias, *, row_tile, compute_dtype,
                          weight_buffers, channels_last_out):
    N, C, H, W = x_nchw.shape
    Cout = weight_oihw.shape[0]
    Hp, Wp = H + 1, W + 1                          # F.pad(x, (0, 1, 0, 1))
    Ho, Wo = (Hp - 3) // 2 + 1, (Wp - 3) // 2 + 1
    Hpe, Wpe = Hp + (Hp % 2), Wp + (Wp % 2)        # pad to even (extras never read)
    Hh, Wh = Hpe // 2, Wpe // 2                    # Hh = Ho + 1, Wh = Wo + 1

    TH = row_tile
    assert Ho % TH == 0 and 1 <= TH <= Ho, (Ho, TH)
    assert (TH * Wo) % 8 == 0 or TH == Ho, (TH, Wo)
    nT = Ho // TH

    cdt = jnp.dtype(compute_dtype)
    # bf16 (by default) MXU operands with f32 accumulation: cast before the
    # pad/phase-split pass so the materialized intermediate + DMA are half-width.
    xc = x_nchw.astype(cdt)
    xp = jnp.pad(xc, ((0, 0), (0, 0), (0, Hpe - H), (0, Wpe - W)))
    xr = xp.reshape(N, C, Hh, 2, Wh, 2).transpose(0, 3, 5, 2, 4, 1)  # (N,2,2,Hh,Wh,C)

    w9 = jnp.transpose(weight_oihw, (2, 3, 1, 0)).reshape(9, C, Cout).astype(cdt)
    b2 = bias.reshape(1, Cout).astype(jnp.float32)

    wmode = dict(pipeline_mode=pl.Buffered(1)) if weight_buffers == 1 else {}

    out_flat = pl.pallas_call(
        _conv_down_kernel,
        out_shape=jax.ShapeDtypeStruct((N, Ho * Wo, Cout), x_nchw.dtype),
        grid=(N, nT),
        in_specs=[
            # main block: both row phases, coarse rows [t*TH, t*TH+TH)
            pl.BlockSpec((1, 2, 2, TH, Wh, C), lambda n, t: (n, 0, 0, t, 0, 0)),
            # halo: row phase 0, single coarse row t*TH+TH
            pl.BlockSpec((1, 1, 2, 1, Wh, C),
                         lambda n, t: (n, 0, 0, t * TH + TH, 0, 0)),
            # resident weights / bias (single-buffered when supported)
            pl.BlockSpec((9, C, Cout), lambda n, t: (0, 0, 0), **wmode),
            pl.BlockSpec((1, Cout), lambda n, t: (0, 0), **wmode),
        ],
        out_specs=pl.BlockSpec((1, TH * Wo, Cout), lambda n, t: (n, t, 0)),
        compiler_params=pltpu.CompilerParams(
            dimension_semantics=("parallel", "parallel"),
            vmem_limit_bytes=_VMEM_LIMIT),
    )(xr, xr, w9, b2)

    out_nhwc = out_flat.reshape(N, Ho, Wo, Cout)   # free view
    if channels_last_out:
        return out_nhwc
    return jnp.transpose(out_nhwc, (0, 3, 1, 2))   # NHWC -> NCHW (module layout)


def downsample_conv(x_nchw, weight_oihw, bias, *, row_tile=None,
                    compute_dtype=jnp.bfloat16, channels_last_out=False):
    """Downsample.forward with with_conv=True.  x: NCHW, weight: OIHW, bias: (Cout,)."""
    N, C, H, W = x_nchw.shape
    Cout = weight_oihw.shape[0]
    Ho, Wo = (H - 2) // 2 + 1, (W - 2) // 2 + 1
    Wh = Wo + 1
    weight_buffers = 1 if _single_buffer_supported() else 2
    cds = jnp.dtype(compute_dtype).itemsize
    ods = jnp.dtype(x_nchw.dtype).itemsize
    TH = row_tile if row_tile is not None else _pick_conv_row_tile(
        N, Ho, Wh, Wo, C, Cout, cds, ods, weight_buffers)
    return _downsample_conv_impl(
        x_nchw, weight_oihw, bias, row_tile=int(TH),
        compute_dtype=jnp.dtype(compute_dtype),
        weight_buffers=weight_buffers, channels_last_out=channels_last_out)


@partial(jax.jit, static_argnames=("chan_tile", "row_tile"))
def _downsample_avgpool_impl(x_nchw, *, chan_tile, row_tile):
    N, C, H, W = x_nchw.shape
    Ho, Wo = H // 2, W // 2
    Wi = 2 * Wo
    x = x_nchw
    if (H != 2 * Ho) or (W != 2 * Wo):             # floor behaviour for odd dims
        x = x[:, :, :2 * Ho, :2 * Wo]
    xv = x.reshape(N, C, Ho, 2 * Wi)               # free view: [row 2ho ; row 2ho+1]

    TC, THo = chan_tile, row_tile
    assert C % TC == 0 and Ho % THo == 0, (C, TC, Ho, THo)
    assert THo % 8 == 0 or THo == Ho, (Ho, THo)

    # width-pooling matrix: column j of the pre-summed rows feeds output j//2
    j = jnp.arange(Wi)
    q = jnp.arange(Wo)
    pmat = ((j[:, None] // 2 == q[None, :]).astype(jnp.float32) * 0.25
            ).astype(x_nchw.dtype)

    return pl.pallas_call(
        _avg_pool_kernel,
        out_shape=jax.ShapeDtypeStruct((N, C, Ho, Wo), x_nchw.dtype),
        grid=(N, C // TC, Ho // THo),
        in_specs=[
            pl.BlockSpec((1, TC, THo, 2 * Wi), lambda n, c, h: (n, c, h, 0)),
            pl.BlockSpec((Wi, Wo), lambda n, c, h: (0, 0)),
        ],
        out_specs=pl.BlockSpec((1, TC, THo, Wo), lambda n, c, h: (n, c, h, 0)),
        compiler_params=pltpu.CompilerParams(
            dimension_semantics=("parallel", "parallel", "parallel"),
            vmem_limit_bytes=_VMEM_LIMIT),
    )(xv, pmat)


def downsample_avgpool(x_nchw, *, chan_tile=None, row_tile=None):
    """Downsample.forward with with_conv=False (avg_pool2d k=2, s=2)."""
    N, C, H, W = x_nchw.shape
    Ho, Wo = H // 2, W // 2
    Wi = 2 * Wo
    ds = jnp.dtype(x_nchw.dtype).itemsize
    tc, tho = _pick_pool_tiles(N, C, Ho, Wi, Wo, ds)
    TC = chan_tile if chan_tile is not None else tc
    THo = row_tile if row_tile is not None else tho
    return _downsample_avgpool_impl(x_nchw, chan_tile=int(TC), row_tile=int(THo))


# --------------------------------------------------------------------------- #
# Pure-JAX references
# --------------------------------------------------------------------------- #

def _ref_conv(x, w, b):
    xp = jnp.pad(x, ((0, 0), (0, 0), (0, 1), (0, 1)))
    out = jax.lax.conv_general_dilated(
        xp, w, window_strides=(2, 2), padding="VALID",
        dimension_numbers=("NCHW", "OIHW", "NCHW"))
    return out + b.reshape(1, -1, 1, 1)


def _ref_pool(x):
    N, C, H, W = x.shape
    return x[:, :, :2 * (H // 2), :2 * (W // 2)].reshape(
        N, C, H // 2, 2, W // 2, 2).mean(axis=(3, 5))


# --------------------------------------------------------------------------- #
# Main
# --------------------------------------------------------------------------- #

if __name__ == "__main__":
    key = jax.random.PRNGKey(0)
    kx, kw, kb = jax.random.split(key, 3)

    N, C, H, W = 2, 4, 16, 16
    x = jax.random.normal(kx, (N, C, H, W), jnp.float32)
    weight = jax.random.normal(kw, (C, C, 3, 3), jnp.float32) * 0.1  # Conv2d(C, C, 3)
    bias = jax.random.normal(kb, (C,), jnp.float32) * 0.1

    ref_conv = _ref_conv(x, weight, bias)
    ref_pool = _ref_pool(x)

    # with_conv=True, exact f32 MXU path (tight tolerance -> validates indexing)
    out_f32 = jax.block_until_ready(
        downsample_conv(x, weight, bias, compute_dtype=jnp.float32))
    assert out_f32.shape == (N, C, H // 2, W // 2), out_f32.shape
    np.testing.assert_allclose(np.asarray(out_f32), np.asarray(ref_conv),
                               rtol=1e-4, atol=1e-4)

    # with_conv=True, default bf16 MXU operands + f32 accumulation
    out_bf16 = jax.block_until_ready(downsample_conv(x, weight, bias))
    np.testing.assert_allclose(np.asarray(out_bf16), np.asarray(ref_conv),
                               rtol=5e-2, atol=5e-2)

    # multi row-tile grid (exercises the halo path) and the TH == 1 path
    out_t4 = jax.block_until_ready(
        downsample_conv(x, weight, bias, row_tile=4, compute_dtype=jnp.float32))
    np.testing.assert_allclose(np.asarray(out_t4), np.asarray(ref_conv),
                               rtol=1e-4, atol=1e-4)
    out_t1 = jax.block_until_ready(
        downsample_conv(x, weight, bias, row_tile=1, compute_dtype=jnp.float32))
    np.testing.assert_allclose(np.asarray(out_t1), np.asarray(ref_conv),
                               rtol=1e-4, atol=1e-4)

    # with_conv=False
    out_pool = jax.block_until_ready(downsample_avgpool(x))
    assert out_pool.shape == (N, C, H // 2, W // 2), out_pool.shape
    np.testing.assert_allclose(np.asarray(out_pool), np.asarray(ref_pool),
                               rtol=1e-4, atol=1e-4)

    # with_conv=False, multi-tile grid over channels and rows
    x2 = jax.random.normal(kx, (1, 4, 32, 32), jnp.float32)
    out_pool_t = jax.block_until_ready(
        downsample_avgpool(x2, chan_tile=2, row_tile=8))
    np.testing.assert_allclose(np.asarray(out_pool_t), np.asarray(_ref_pool(x2)),
                               rtol=1e-4, atol=1e-4)

    print("KERNEL_OK")
</pallas_src>

<mosaic_0001>
module attributes {stable_mosaic.version = 11 : i64} {
  func.func @_copy(%arg0: i32, %arg1: memref<8x128xf32, #tpu.memory_space<vmem>>, %arg2: memref<8x128xf32, #tpu.memory_space<vmem>>) attributes {dimension_semantics = [#tpu.dimension_semantics<arbitrary>], iteration_bounds = array<i64: 2>, scalar_prefetch = 0 : i64, scratch_operands = 0 : i64, tpu.core_type = #tpu.core_type<tc>, window_params = [{pipeline_mode = #tpu.pipeline_mode<synchronous>, transform_indices = @transform_0, window_bounds = array<i64: 8, 128>}, {pipeline_mode = #tpu.pipeline_mode<synchronous>, transform_indices = @transform_1, window_bounds = array<i64: 8, 128>}]} {
    %c0 = arith.constant 0 : index
    %c0_0 = arith.constant 0 : index
    %0 = vector.load %arg1[%c0, %c0_0] : memref<8x128xf32, #tpu.memory_space<vmem>>, vector<8x128xf32>
    %c0_1 = arith.constant 0 : index
    %c0_2 = arith.constant 0 : index
    %1 = vector.load %arg2[%c0_1, %c0_2] : memref<8x128xf32, #tpu.memory_space<vmem>>, vector<8x128xf32>
    tpu.vector_store %arg2[%c0_1, %c0_2], %0 {strides = array<i32>} : memref<8x128xf32, #tpu.memory_space<vmem>>, vector<8x128xf32>,
    return
  }
  func.func @transform_0(%arg0: i32) -> (i32, i32) {
    %c0_i32 = arith.constant 0 : i32
    %c0_i32_0 = arith.constant 0 : i32
    %c0_i32_1 = arith.constant 0 : i32
    return %c0_i32, %c0_i32_0 : i32, i32
  }
  func.func @transform_1(%arg0: i32) -> (i32, i32) {
    %c0_i32 = arith.constant 0 : i32
    %c0_i32_0 = arith.constant 0 : i32
    %c0_i32_1 = arith.constant 0 : i32
    return %c0_i32, %c0_i32_0 : i32, i32
  }
}

module attributes {stable_mosaic.version = 11 : i64} {
  func.func @_conv_down_kernel(%arg0: i32, %arg1: i32, %arg2: memref<1x2x2x8x9x4xf32, #tpu.memory_space<vmem>>, %arg3: memref<1x1x2x1x9x4xf32, #tpu.memory_space<vmem>>, %arg4: memref<9x4x4xf32, #tpu.memory_space<vmem>>, %arg5: memref<1x4xf32, #tpu.memory_space<vmem>>, %arg6: memref<1x64x4xf32, #tpu.memory_space<vmem>>) attributes {dimension_semantics = [#tpu.dimension_semantics<parallel>, #tpu.dimension_semantics<parallel>], iteration_bounds = array<i64: 2, 1>, scalar_prefetch = 0 : i64, scratch_operands = 0 : i64, tpu.core_type = #tpu.core_type<tc>, window_params = [{transform_indices = @transform_0, window_bounds = array<i64: 1, 2, 2, 8, 9, 4>}, {transform_indices = @transform_1, window_bounds = array<i64: 1, 1, 2, 1, 9, 4>}, {pipeline_mode = #tpu.pipeline_mode<synchronous>, transform_indices = @transform_2, window_bounds = array<i64: 9, 4, 4>}, {pipeline_mode = #tpu.pipeline_mode<synchronous>, transform_indices = @transform_3, window_bounds = array<i64: 1, 4>}, {transform_indices = @transform_4, window_bounds = array<i64: 1, 64, 4>}]} {
    %c0 = arith.constant 0 : index
    %c0_0 = arith.constant 0 : index
    %0 = vector.load %arg5[%c0, %c0_0] : memref<1x4xf32, #tpu.memory_space<vmem>>, vector<1x4xf32>
    %c0_1 = arith.constant 0 : index
    %c0_2 = arith.constant 0 : index
    %c0_3 = arith.constant 0 : index
    %c0_4 = arith.constant 0 : index
    %c0_5 = arith.constant 0 : index
    %c0_6 = arith.constant 0 : index
    %1 = vector.load %arg2[%c0_1, %c0_2, %c0_3, %c0_4, %c0_5, %c0_6] : memref<1x2x2x8x9x4xf32, #tpu.memory_space<vmem>>, vector<1x1x1x8x8x4xf32>
    %2 = vector.shape_cast %1 : vector<1x1x1x8x8x4xf32> to vector<8x8x4xf32>
    %3 = vector.shape_cast %2 : vector<8x8x4xf32> to vector<64x4xf32>
    %c0_7 = arith.constant 0 : index
    %c0_8 = arith.constant 0 : index
    %c0_9 = arith.constant 0 : index
    %4 = vector.load %arg4[%c0_7, %c0_8, %c0_9] : memref<9x4x4xf32, #tpu.memory_space<vmem>>, vector<1x4x4xf32>
    %5 = vector.shape_cast %4 : vector<1x4x4xf32> to vector<4x4xf32>
    %cst = arith.constant dense<0.000000e+00> : vector<64x4xf32>
    %6 = tpu.matmul %3, %5, %cst {dimension_numbers = #tpu.dot_dimension_numbers<[1], [0], [0], [1], [0, 0, 1, 1], [], []>} : vector<64x4xf32>, vector<4x4xf32>, vector<64x4xf32> -> vector<64x4xf32>
    %7 = vector.broadcast %0 : vector<1x4xf32> to vector<64x4xf32>
    %8 = arith.addf %7, %6 : vector<64x4xf32>
    %c0_10 = arith.constant 0 : index
    %c0_11 = arith.constant 0 : index
    %c1 = arith.constant 1 : index
    %c0_12 = arith.constant 0 : index
    %c0_13 = arith.constant 0 : index
    %c0_14 = arith.constant 0 : index
    %9 = vector.load %arg2[%c0_10, %c0_11, %c1, %c0_12, %c0_13, %c0_14] : memref<1x2x2x8x9x4xf32, #tpu.memory_space<vmem>>, vector<1x1x1x8x8x4xf32>
    %10 = vector.shape_cast %9 : vector<1x1x1x8x8x4xf32> to vector<8x8x4xf32>
    %11 = vector.shape_cast %10 : vector<8x8x4xf32> to vector<64x4xf32>
    %c1_15 = arith.constant 1 : index
    %c0_16 = arith.constant 0 : index
    %c0_17 = arith.constant 0 : index
    %12 = vector.load %arg4[%c1_15, %c0_16, %c0_17] : memref<9x4x4xf32, #tpu.memory_space<vmem>>, vector<1x4x4xf32>
    %13 = vector.shape_cast %12 : vector<1x4x4xf32> to vector<4x4xf32>
    %cst_18 = arith.constant dense<0.000000e+00> : vector<64x4xf32>
    %14 = tpu.matmul %11, %13, %cst_18 {dimension_numbers = #tpu.dot_dimension_numbers<[1], [0], [0], [1], [0, 0, 1, 1], [], []>} : vector<64x4xf32>, vector<4x4xf32>, vector<64x4xf32> -> vector<64x4xf32>
    %15 = arith.addf %8, %14 : vector<64x4xf32>
    %c0_19 = arith.constant 0 : index
    %c0_20 = arith.constant 0 : index
    %c0_21 = arith.constant 0 : index
    %c0_22 = arith.constant 0 : index
    %c1_23 = arith.constant 1 : index
    %c0_24 = arith.constant 0 : index
    %16 = vector.load %arg2[%c0_19, %c0_20, %c0_21, %c0_22, %c1_23, %c0_24] : memref<1x2x2x8x9x4xf32, #tpu.memory_space<vmem>>, vector<1x1x1x8x8x4xf32>
    %17 = vector.shape_cast %16 : vector<1x1x1x8x8x4xf32> to vector<8x8x4xf32>
    %18 = vector.shape_cast %17 : vector<8x8x4xf32> to vector<64x4xf32>
    %c2 = arith.constant 2 : index
    %c0_25 = arith.constant 0 : index
    %c0_26 = arith.constant 0 : index
    %19 = vector.load %arg4[%c2, %c0_25, %c0_26] : memref<9x4x4xf32, #tpu.memory_space<vmem>>, vector<1x4x4xf32>
    %20 = vector.shape_cast %19 : vector<1x4x4xf32> to vector<4x4xf32>
    %cst_27 = arith.constant dense<0.000000e+00> : vector<64x4xf32>
    %21 = tpu.matmul %18, %20, %cst_27 {dimension_numbers = #tpu.dot_dimension_numbers<[1], [0], [0], [1], [0, 0, 1, 1], [], []>} : vector<64x4xf32>, vector<4x4xf32>, vector<64x4xf32> -> vector<64x4xf32>
    %22 = arith.addf %15, %21 : vector<64x4xf32>
    %c0_28 = arith.constant 0 : index
    %c1_29 = arith.constant 1 : index
    %c0_30 = arith.constant 0 : index
    %c0_31 = arith.constant 0 : index
    %c0_32 = arith.constant 0 : index
    %c0_33 = arith.constant 0 : index
    %23 = vector.load %arg2[%c0_28, %c1_29, %c0_30, %c0_31, %c0_32, %c0_33] : memref<1x2x2x8x9x4xf32, #tpu.memory_space<vmem>>, vector<1x1x1x8x8x4xf32>
    %24 = vector.shape_cast %23 : vector<1x1x1x8x8x4xf32> to vector<8x8x4xf32>
    %25 = vector.shape_cast %24 : vector<8x8x4xf32> to vector<64x4xf32>
    %c3 = arith.constant 3 : index
    %c0_34 = arith.constant 0 : index
    %c0_35 = arith.constant 0 : index
    %26 = vector.load %arg4[%c3, %c0_34, %c0_35] : memref<9x4x4xf32, #tpu.memory_space<vmem>>, vector<1x4x4xf32>
    %27 = vector.shape_cast %26 : vector<1x4x4xf32> to vector<4x4xf32>
    %cst_36 = arith.constant dense<0.000000e+00> : vector<64x4xf32>
    %28 = tpu.matmul %25, %27, %cst_36 {dimension_numbers = #tpu.dot_dimension_numbers<[1], [0], [0], [1], [0, 0, 1, 1], [], []>} : vector<64x4xf32>, vector<4x4xf32>, vector<64x4xf32> -> vector<64x4xf32>
    %29 = arith.addf %22, %28 : vector<64x4xf32>
    %c0_37 = arith.constant 0 : index
    %c1_38 = arith.constant 1 : index
    %c1_39 = arith.constant 1 : index
    %c0_40 = arith.constant 0 : index
    %c0_41 = arith.constant 0 : index
    %c0_42 = arith.constant 0 : index
    %30 = vector.load %arg2[%c0_37, %c1_38, %c1_39, %c0_40, %c0_41, %c0_42] : memref<1x2x2x8x9x4xf32, #tpu.memory_space<vmem>>, vector<1x1x1x8x8x4xf32>
    %31 = vector.shape_cast %30 : vector<1x1x1x8x8x4xf32> to vector<8x8x4xf32>
    %32 = vector.shape_cast %31 : vector<8x8x4xf32> to vector<64x4xf32>
    %c4 = arith.constant 4 : index
    %c0_43 = arith.constant 0 : index
    %c0_44 = arith.constant 0 : index
    %33 = vector.load %arg4[%c4, %c0_43, %c0_44] : memref<9x4x4xf32, #tpu.memory_space<vmem>>, vector<1x4x4xf32>
    %34 = vector.shape_cast %33 : vector<1x4x4xf32> to vector<4x4xf32>
    %cst_45 = arith.constant dense<0.000000e+00> : vector<64x4xf32>
    %35 = tpu.matmul %32, %34, %cst_45 {dimension_numbers = #tpu.dot_dimension_numbers<[1], [0], [0], [1], [0, 0, 1, 1], [], []>} : vector<64x4xf32>, vector<4x4xf32>, vector<64x4xf32> -> vector<64x4xf32>
    %36 = arith.addf %29, %35 : vector<64x4xf32>
    %c0_46 = arith.constant 0 : index
    %c1_47 = arith.constant 1 : index
    %c0_48 = arith.constant 0 : index
    %c0_49 = arith.constant 0 : index
    %c1_50 = arith.constant 1 : index
    %c0_51 = arith.constant 0 : index
    %37 = vector.load %arg2[%c0_46, %c1_47, %c0_48, %c0_49, %c1_50, %c0_51] : memref<1x2x2x8x9x4xf32, #tpu.memory_space<vmem>>, vector<1x1x1x8x8x4xf32>
    %38 = vector.shape_cast %37 : vector<1x1x1x8x8x4xf32> to vector<8x8x4xf32>
    %39 = vector.shape_cast %38 : vector<8x8x4xf32> to vector<64x4xf32>
    %c5 = arith.constant 5 : index
    %c0_52 = arith.constant 0 : index
    %c0_53 = arith.constant 0 : index
    %40 = vector.load %arg4[%c5, %c0_52, %c0_53] : memref<9x4x4xf32, #tpu.memory_space<vmem>>, vector<1x4x4xf32>
    %41 = vector.shape_cast %40 : vector<1x4x4xf32> to vector<4x4xf32>
    %cst_54 = arith.constant dense<0.000000e+00> : vector<64x4xf32>
    %42 = tpu.matmul %39, %41, %cst_54 {dimension_numbers = #tpu.dot_dimension_numbers<[1], [0], [0], [1], [0, 0, 1, 1], [], []>} : vector<64x4xf32>, vector<4x4xf32>, vector<64x4xf32> -> vector<64x4xf32>
    %43 = arith.addf %36, %42 : vector<64x4xf32>
    %c0_55 = arith.constant 0 : index
    %c0_56 = arith.constant 0 : index
    %c0_57 = arith.constant 0 : index
    %c1_58 = arith.constant 1 : index
    %c0_59 = arith.constant 0 : index
    %c0_60 = arith.constant 0 : index
    %44 = vector.load %arg2[%c0_55, %c0_56, %c0_57, %c1_58, %c0_59, %c0_60] : memref<1x2x2x8x9x4xf32, #tpu.memory_space<vmem>>, vector<1x1x2x7x9x4xf32>
    %45 = vector.shape_cast %44 : vector<1x1x2x7x9x4xf32> to vector<2x7x9x4xf32>
    %c0_61 = arith.constant 0 : index
    %c0_62 = arith.constant 0 : index
    %c0_63 = arith.constant 0 : index
    %c0_64 = arith.constant 0 : index
    %c0_65 = arith.constant 0 : index
    %c0_66 = arith.constant 0 : index
    %46 = vector.load %arg3[%c0_61, %c0_62, %c0_63, %c0_64, %c0_65, %c0_66] : memref<1x1x2x1x9x4xf32, #tpu.memory_space<vmem>>, vector<1x1x2x1x9x4xf32>
    %47 = vector.shape_cast %46 : vector<1x1x2x1x9x4xf32> to vector<2x1x9x4xf32>
    %48 = tpu.concatenate %45, %47 in 1 : vector<2x7x9x4xf32>, vector<2x1x9x4xf32> -> vector<2x8x9x4xf32>
    %49 = vector.extract_strided_slice %48 {offsets = [0, 0, 0, 0], sizes = [1, 8, 8, 4], strides = [1, 1, 1, 1]} : vector<2x8x9x4xf32> to vector<1x8x8x4xf32>
    %50 = vector.shape_cast %49 : vector<1x8x8x4xf32> to vector<8x8x4xf32>
    %51 = vector.shape_cast %50 : vector<8x8x4xf32> to vector<64x4xf32>
    %c6 = arith.constant 6 : index
    %c0_67 = arith.constant 0 : index
    %c0_68 = arith.constant 0 : index
    %52 = vector.load %arg4[%c6, %c0_67, %c0_68] : memref<9x4x4xf32, #tpu.memory_space<vmem>>, vector<1x4x4xf32>
    %53 = vector.shape_cast %52 : vector<1x4x4xf32> to vector<4x4xf32>
    %cst_69 = arith.constant dense<0.000000e+00> : vector<64x4xf32>
    %54 = tpu.matmul %51, %53, %cst_69 {dimension_numbers = #tpu.dot_dimension_numbers<[1], [0], [0], [1], [0, 0, 1, 1], [], []>} : vector<64x4xf32>, vector<4x4xf32>, vector<64x4xf32> -> vector<64x4xf32>
    %55 = arith.addf %43, %54 : vector<64x4xf32>
    %56 = vector.extract_strided_slice %48 {offsets = [1, 0, 0, 0], sizes = [1, 8, 8, 4], strides = [1, 1, 1, 1]} : vector<2x8x9x4xf32> to vector<1x8x8x4xf32>
    %57 = vector.shape_cast %56 : vector<1x8x8x4xf32> to vector<8x8x4xf32>
    %58 = vector.shape_cast %57 : vector<8x8x4xf32> to vector<64x4xf32>
    %c7 = arith.constant 7 : index
    %c0_70 = arith.constant 0 : index
    %c0_71 = arith.constant 0 : index
    %59 = vector.load %arg4[%c7, %c0_70, %c0_71] : memref<9x4x4xf32, #tpu.memory_space<vmem>>, vector<1x4x4xf32>
    %60 = vector.shape_cast %59 : vector<1x4x4xf32> to vector<4x4xf32>
    %cst_72 = arith.constant dense<0.000000e+00> : vector<64x4xf32>
    %61 = tpu.matmul %58, %60, %cst_72 {dimension_numbers = #tpu.dot_dimension_numbers<[1], [0], [0], [1], [0, 0, 1, 1], [], []>} : vector<64x4xf32>, vector<4x4xf32>, vector<64x4xf32> -> vector<64x4xf32>
    %62 = arith.addf %55, %61 : vector<64x4xf32>
    %63 = vector.extract_strided_slice %48 {offsets = [0, 0, 1, 0], sizes = [1, 8, 8, 4], strides = [1, 1, 1, 1]} : vector<2x8x9x4xf32> to vector<1x8x8x4xf32>
    %64 = vector.shape_cast %63 : vector<1x8x8x4xf32> to vector<8x8x4xf32>
    %65 = vector.shape_cast %64 : vector<8x8x4xf32> to vector<64x4xf32>
    %c8 = arith.constant 8 : index
    %c0_73 = arith.constant 0 : index
    %c0_74 = arith.constant 0 : index
    %66 = vector.load %arg4[%c8, %c0_73, %c0_74] : memref<9x4x4xf32, #tpu.memory_space<vmem>>, vector<1x4x4xf32>
    %67 = vector.shape_cast %66 : vector<1x4x4xf32> to vector<4x4xf32>
    %cst_75 = arith.constant dense<0.000000e+00> : vector<64x4xf32>
    %68 = tpu.matmul %65, %67, %cst_75 {dimension_numbers = #tpu.dot_dimension_numbers<[1], [0], [0], [1], [0, 0, 1, 1], [], []>} : vector<64x4xf32>, vector<4x4xf32>, vector<64x4xf32> -> vector<64x4xf32>
    %69 = arith.addf %62, %68 : vector<64x4xf32>
    %c0_76 = arith.constant 0 : index
    %c0_77 = arith.constant 0 : index
    %c0_78 = arith.constant 0 : index
    %70 = vector.load %arg6[%c0_76, %c0_77, %c0_78] : memref<1x64x4xf32, #tpu.memory_space<vmem>>, vector<1x64x4xf32>
    %71 = vector.shape_cast %70 : vector<1x64x4xf32> to vector<64x4xf32>
    %72 = vector.shape_cast %69 : vector<64x4xf32> to vector<1x64x4xf32>
    tpu.vector_store %arg6[%c0_76, %c0_77, %c0_78], %72 {strides = array<i32>} : memref<1x64x4xf32, #tpu.memory_space<vmem>>, vector<1x64x4xf32>,
    return
  }
  func.func @transform_0(%arg0: i32, %arg1: i32) -> (i32, i32, i32, i32, i32, i32) {
    %c0_i32 = arith.constant 0 : i32
    %c0_i32_0 = arith.constant 0 : i32
    %c0_i32_1 = arith.constant 0 : i32
    %c0_i32_2 = arith.constant 0 : i32
    %c0_i32_3 = arith.constant 0 : i32
    return %arg0, %c0_i32, %c0_i32_0, %arg1, %c0_i32_1, %c0_i32_2 : i32, i32, i32, i32, i32, i32
  }
  func.func @transform_1(%arg0: i32, %arg1: i32) -> (i32, i32, i32, i32, i32, i32) {
    %c8_i32 = arith.constant 8 : i32
    %0 = arith.muli %arg1, %c8_i32 : i32
    %c8_i32_0 = arith.constant 8 : i32
    %1 = arith.addi %0, %c8_i32_0 : i32
    %c0_i32 = arith.constant 0 : i32
    %c0_i32_1 = arith.constant 0 : i32
    %c0_i32_2 = arith.constant 0 : i32
    %c0_i32_3 = arith.constant 0 : i32
    %c0_i32_4 = arith.constant 0 : i32
    return %arg0, %c0_i32, %c0_i32_1, %1, %c0_i32_2, %c0_i32_3 : i32, i32, i32, i32, i32, i32
  }
  func.func @transform_2(%arg0: i32, %arg1: i32) -> (i32, i32, i32) {
    %c0_i32 = arith.constant 0 : i32
    %c0_i32_0 = arith.constant 0 : i32
    %c0_i32_1 = arith.constant 0 : i32
    %c0_i32_2 = arith.constant 0 : i32
    return %c0_i32, %c0_i32_0, %c0_i32_1 : i32, i32, i32
  }
  func.func @transform_3(%arg0: i32, %arg1: i32) -> (i32, i32) {
    %c0_i32 = arith.constant 0 : i32
    %c0_i32_0 = arith.constant 0 : i32
    %c0_i32_1 = arith.constant 0 : i32
    return %c0_i32, %c0_i32_0 : i32, i32
  }
  func.func @transform_4(%arg0: i32, %arg1: i32) -> (i32, i32, i32) {
    %c0_i32 = arith.constant 0 : i32
    %c0_i32_0 = arith.constant 0 : i32
    return %arg0, %arg1, %c0_i32 : i32, i32, i32
  }
}

</mosaic_0001>

<bundles_post_ra>
// kernel: tpu_custom_call.1
= control target key start
LH: loop header
LB: loop body
LE: loop exit
PB: predicated region body
PF: predicated region fallthrough
CT: control target
= control target key end

     0   :  { %6 = vsyncpa [#allocation3], 0  ;;  %s340_s0 = inlined_call_operand.hbm [shape: f32[8,128], index: 0, kind: input, shape index: {}]   ;;  %s341_s1 = inlined_call_operand.hbm [shape: f32[8,128], index: 1, kind: output, shape index: {}]  }
   0x1   :  { %7 = vsyncpa [#allocation4], 0  ;;  %s261_s6 = smov 0  }
   0x2 LB: > { %s144_s7 = sadd.s32 4294967295, %s247_s6   ;;  %p145_p0 = scmp.ge.s32.totalorder %s247_s6, 1  ;;  %s247_s6 = sphi %s261_s6, %s13_s6  }
   0x3   : > { %p60_p1 = scmp.lt.s32.totalorder %s247_s6, 3  ;;  %p275_p3 = scmp.eq.s32.totalorder %s144_s7, 0 }
   0x4   : > { %s249_s10 = smov [#allocation2]   ;;  %s179_s15 = scalar_lea.hbm %s340_s0, 128 }
   0x5   : > { %p269_p2 = pnand %p145_p0, %p60_p1  ;;  %s73_s11 = sshll.u32 %s249_s10, 4  ;;  %s74_s11 = int_to_ptr.vmem [resolvable:$true] %s73_s11 }
   0x6   : > { %s346_s9 = scalar_select %p275_p3, 1, 0 }
   0x7   : > { %s345_s8 = scalar_select %p269_p2, 1, 0 }
   0x8   : > { %p161_p4 = pneg %p269_p2  ;;  %p180_p6 = scmp.ne.s32.totalorder %s340_s0, %s179_s15 }
   0x9   : > { %p186_p10 = scmp.lt.u32.totalorder %s179_s15, %s340_s0 }
   0xa   : > { %p283_p5 = pnand %p275_p3, %p161_p4 }
   0xc   : > { %p181_p7 = pneg %p283_p5 }
   0xe   : > { %p182_p8 = pnand %p181_p7, %p180_p6 }
  0x10   : > { %p183_p9 = pneg %p182_p8 }
  0x12   : > { %p188_p11 = pnand %p186_p10, %p183_p9 }
  0x14   : > { %191 = shalt.err (!%p188_p11)
}
  0x15   : > { %s192_s20 = scalar_lea.vmem %s74_s11, 128  ;;  %p200_p1 = scmp.lt.s32.totalorder %s74_s11, %s74_s11 }
  0x16   : > { %p193_p12 = scmp.ne.s32.totalorder %s74_s11, %s192_s20  ;;  %p201_p4 = scmp.lt.s32.totalorder %s192_s20, %s192_s20 }
  0x18   : > { %p195_p13 = pnand %p193_p12, %p181_p7  ;;  %p202_p3 = por %p201_p4, %p200_p1 }
  0x1a   : > { %p196_p0 = pneg %p195_p13 }
  0x1c   : > { %p203_p2 = pnand %p202_p3, %p196_p0 }
  0x1e   : > { %206 = shalt.err (!%p203_p2)
}
  0x1f   : > { %164 = dma.hbm_to_vmem [thread:$0]  (!%p283_p5), %s340_s0, 128, %s74_s11, [#allocation3]  }
  0x20   : > { %p348_p6 = scmp.ne.s32.totalorder %s345_s8, 0 }
  0x21   : > { %p349_p8 = scmp.ne.s32.totalorder (!%p348_p6), %s346_s9, 0 }
  0x22   : > { %86 = sbr.rel (%p348_p6) target bundleno = 67 (0x43), region = 24 }
  0x29   : > { %238 = dma.done.wait (%p349_p8), [#allocation3], 128  }
  0x2a   : > { %240 = vsyncadd (%p349_p8), [#allocation3], 4294967168  ;;  %s250_s23 = smov [#allocation5]   ;;  %p311_p2 = scmp.eq.s32.totalorder %s144_s7, 1  ;;  %v96_v0 = vld [vmem:[#allocation2] sm:$0xff] }
  0x2b   : > { %s105_s24 = sshll.u32 %s250_s23, 4  ;;  %97 = vst [vmem:[#allocation5] sm:$0xff] %v96_v0  ;;  %s106_s24 = int_to_ptr.vmem [resolvable:$true] %s105_s24 }
  0x2c   : > { %s207_s26 = scalar_lea.vmem %s106_s24, 128  ;;  %p214_p9 = scmp.lt.s32.totalorder %s106_s24, %s106_s24 }
  0x2d   : > { %p208_p3 = scmp.ne.s32.totalorder %s106_s24, %s207_s26  ;;  %p215_p10 = scmp.lt.s32.totalorder %s207_s26, %s207_s26 }
  0x2f   : > { %p209_p5 = pnand %p208_p3, %p311_p2  ;;  %p216_p11 = por %p215_p10, %p214_p9 }
  0x31   : > { %p210_p7 = pneg %p209_p5 }
  0x33   : > { %p217_p12 = pnand %p216_p11, %p210_p7 }
  0x35   : > { %220 = shalt.err (!%p217_p12)
}
  0x36   : > { %s221_s29 = scalar_lea.hbm %s341_s1, 128 }
  0x37   : > { %p222_p13 = scmp.ne.s32.totalorder %s341_s1, %s221_s29  ;;  %p227_p4 = scmp.lt.u32.totalorder %s221_s29, %s341_s1 }
  0x39   : > { %p223_p0 = pnand %p222_p13, %p311_p2 }
  0x3b   : > { %p224_p1 = pneg %p223_p0 }
  0x3d   : > { %p229_p6 = pnand %p227_p4, %p224_p1 }
  0x3f   : > { %232 = shalt.err (!%p229_p6)
}
  0x40   : > { %158 = dma.vmem_to_hbm [thread:$0]  (%p311_p2), %s106_s24, 128, %s341_s1, [#allocation4]  }
  0x41   : > { %242 = dma.done.wait (%p311_p2), [#allocation4], 128  }
  0x42   : > { %244 = vsyncadd (%p311_p2), [#allocation4], 4294967168 }
  0x43 PF: > { %s13_s6 = sadd.s32 1, %s247_s6  }
  0x44   : > { %p10_p8 = scmp.ge.s32.totalorder %s13_s6, 4  }
  0x46   :  { %12 = sbr.rel (!%p10_p8) target bundleno = 2 (0x2), region = 53 }
  0x4d   :  { %118 = vsyncpa [#allocation3], 1 }
  0x4e   :  { %120 = vsyncpa [#allocation3 + $0x1], 1 }
  0x4f   :  { %121 = vsyncpa [#allocation4], 1 }
  0x50   :  { %123 = vsyncpa [#allocation4 + $0x1], 1 }

// kernel: _downsample_conv_impl.1
= control target key start
LH: loop header
LB: loop body
LE: loop exit
PB: predicated region body
PF: predicated region fallthrough
CT: control target
= control target key end

     0   :  { %s2852_s15 = smov 0   ;;  %s2854_s16 = smov 0   ;;  %s3330_s0 = inlined_call_operand.vmem [shape: f32[2,2,2,9,9,4], index: 0, kind: input, shape index: {}, may-alias: {0,1}]   ;;  %s3331_s1 = inlined_call_operand.vmem [shape: f32[2,2,2,9,9,4], index: 1, kind: input, shape index: {}, may-alias: {0,1}]   ;;  %s3332_s2 = inlined_call_operand.vmem [shape: f32[9,4,4], index: 2, kind: input, shape index: {}]   ;;  %s3333_s3 = inlined_call_operand.vmem [shape: f32[1,4], index: 3, kind: input, shape index: {}]   ;;  %s3334_s4 = inlined_call_operand.vmem [shape: f32[2,64,4], index: 4, kind: output, shape index: {}]  }
   0x1   :  { %s2856_s17 = smov 0   ;;  %s2858_s18 = smov 0  }
   0x2   :  { %s2860_s19 = smov 0  }
   0x3 LB: > { %s26_s20 = sadd.s32 1, %s2817_s18  ;;  %p42_p1 = scmp.ne.s32.totalorder %s2809_s16, %s2805_s15  ;;  %s2821_s19 = sphi %s2860_s19, %s14_s19   ;;  %s2817_s18 = sphi %s2858_s18, %s3339_s18   ;;  %s2813_s17 = sphi %s2856_s17, %s3338_s17   ;;  %s2809_s16 = sphi %s2854_s16, %s3337_s16   ;;  %s2805_s15 = sphi %s2852_s15, %s3336_s15  }
   0x4   : > { %p28_p0 = scmp.ge.s32.totalorder %s26_s20, 2  ;;  %p43_p2 = scmp.eq.s32.totalorder %s2821_s19, 0 }
   0x5   : > { %s35_s23 = sadd.s32 1, %s2809_s16  ;;  %p2245_p5 = scmp.ge.s32.totalorder %s2821_s19, 2 }
   0x6   : > { %s3341_s20 = smov (%p28_p0, %s26_s20), 0  ;;  %p2883_p3 = por %p43_p2, %p42_p1 }
   0x7   : > { %s30_s22 = ssub.s32 %s2817_s18, %s3341_s20  ;;  %176 = sbr.rel (%p2245_p5) target bundleno = 61 (0x3d), region = 24 }
   0x8   : > { %p33_p4 = scmp.eq.s32.totalorder %s30_s22, 0 }
   0xa   : > { %s2891_s24 = scalar_select %p33_p4, %s2809_s16, %s35_s23  }
   0xe   : > { %179 = sbr.rel (!%p2883_p3) target bundleno = 54 (0x36), region = 28  ;;  %s181_s25 = sand.u32 (%p2883_p3), 1, %s2809_s16  }
   0xf   : > { %s2694_s26 = smul.u32 (%p2883_p3), 576, %s2817_s18  ;;  %s2246_s27 = sshll.u32 (%p2883_p3), %s181_s25, 9 }
  0x10   : > { %s2903_s5 = scalar_lea.vmem (%p2883_p3), [#allocation2], %s2246_s27   ;;  %s2905_s6 = smov (%p2883_p3), 0  }
  0x11   : > { %s2901_s30 = scalar_lea.vmem (%p2883_p3), %s3330_s0, %s2694_s26  }
  0x15 LB: >> { %v393_v0 = vld [vmem:[%s2901_s30] sm:$0xff]  ;;  %v395_v1 = vld [vmem:[%s2901_s30 + $0x8] sm:$0xff]  ;;  %v397_v2 = vld [vmem:[%s2901_s30 + $0x10] sm:$0xff]  ;;  %s387_s6 = sadd.s32 1, %s2825_s6   ;;  %s2825_s6 = sphi %s2905_s6, %s387_s6  }
  0x16   : >> { %394 = vst [vmem:[%s2903_s5] sm:$0xff] %v393_v0  ;;  %396 = vst [vmem:[%s2903_s5 + $0x8] sm:$0xff] %v395_v1  ;;  %v399_v3 = vld [vmem:[%s2901_s30 + $0x18] sm:$0xff]  ;;  %v401_v4 = vld [vmem:[%s2901_s30 + $0x20] sm:$0xff]  ;;  %p386_p6 = scmp.ge.s32.totalorder %s387_s6, 1 }
  0x17   : >> { %398 = vst [vmem:[%s2903_s5 + $0x10] sm:$0xff] %v397_v2  ;;  %v403_v5 = vld [vmem:[%s2901_s30 + $0x28] sm:$0xff]  ;;  %400 = vst [vmem:[%s2903_s5 + $0x18] sm:$0xff] %v399_v3  ;;  %v405_v6 = vld [vmem:[%s2901_s30 + $0x30] sm:$0xff] }
  0x18   : >> { %402 = vst [vmem:[%s2903_s5 + $0x20] sm:$0xff] %v401_v4  ;;  %404 = vst [vmem:[%s2903_s5 + $0x28] sm:$0xff] %v403_v5  ;;  %v407_v7 = vld [vmem:[%s2901_s30 + $0x38] sm:$0xff]  ;;  %v409_v8 = vld [vmem:[%s2901_s30 + $0x40] sm:$0xff] }
  0x19   : >> { %406 = vst [vmem:[%s2903_s5 + $0x30] sm:$0xff] %v405_v6  ;;  %408 = vst [vmem:[%s2903_s5 + $0x38] sm:$0xff] %v407_v7  ;;  %v411_v9 = vld [vmem:[%s2901_s30 + $0x48] sm:$0xff]  ;;  %v413_v10 = vld [vmem:[%s2901_s30 + $0x50] sm:$0xff] }
  0x1a   : >> { %410 = vst [vmem:[%s2903_s5 + $0x40] sm:$0xff] %v409_v8  ;;  %v415_v11 = vld [vmem:[%s2901_s30 + $0x58] sm:$0xff]  ;;  %412 = vst [vmem:[%s2903_s5 + $0x48] sm:$0xff] %v411_v9  ;;  %v417_v12 = vld [vmem:[%s2901_s30 + $0x60] sm:$0xff] }
  0x1b   : >> { %414 = vst [vmem:[%s2903_s5 + $0x50] sm:$0xff] %v413_v10  ;;  %416 = vst [vmem:[%s2903_s5 + $0x58] sm:$0xff] %v415_v11  ;;  %v419_v13 = vld [vmem:[%s2901_s30 + $0x68] sm:$0xff]  ;;  %v421_v14 = vld [vmem:[%s2901_s30 + $0x70] sm:$0xff] }
  0x1c   : >> { %418 = vst [vmem:[%s2903_s5 + $0x60] sm:$0xff] %v417_v12  ;;  %420 = vst [vmem:[%s2903_s5 + $0x68] sm:$0xff] %v419_v13  ;;  %v423_v15 = vld [vmem:[%s2901_s30 + $0x78] sm:$0xff]  ;;  %v425_v16 = vld [vmem:[%s2901_s30 + $0x90] sm:$0xff] }
  0x1d   : >> { %422 = vst [vmem:[%s2903_s5 + $0x70] sm:$0xff] %v421_v14  ;;  %v427_v17 = vld [vmem:[%s2901_s30 + $0x98] sm:$0xff]  ;;  %424 = vst [vmem:[%s2903_s5 + $0x78] sm:$0xff] %v423_v15  ;;  %v429_v18 = vld [vmem:[%s2901_s30 + $0xa0] sm:$0xff] }
  0x1e   : >> { %426 = vst [vmem:[%s2903_s5 + $0x80] sm:$0xff] %v425_v16  ;;  %428 = vst [vmem:[%s2903_s5 + $0x88] sm:$0xff] %v427_v17  ;;  %v431_v19 = vld [vmem:[%s2901_s30 + $0xa8] sm:$0xff]  ;;  %v433_v20 = vld [vmem:[%s2901_s30 + $0xb0] sm:$0xff] }
  0x1f   : >> { %430 = vst [vmem:[%s2903_s5 + $0x90] sm:$0xff] %v429_v18  ;;  %432 = vst [vmem:[%s2903_s5 + $0x98] sm:$0xff] %v431_v19  ;;  %v435_v21 = vld [vmem:[%s2901_s30 + $0xb8] sm:$0xff]  ;;  %v437_v22 = vld [vmem:[%s2901_s30 + $0xc0] sm:$0xff] }
  0x20   : >> { %434 = vst [vmem:[%s2903_s5 + $0xa0] sm:$0xff] %v433_v20  ;;  %v439_v23 = vld [vmem:[%s2901_s30 + $0xc8] sm:$0xff]  ;;  %436 = vst [vmem:[%s2903_s5 + $0xa8] sm:$0xff] %v435_v21  ;;  %v441_v24 = vld [vmem:[%s2901_s30 + $0xd0] sm:$0xff] }
  0x21   : >> { %438 = vst [vmem:[%s2903_s5 + $0xb0] sm:$0xff] %v437_v22  ;;  %440 = vst [vmem:[%s2903_s5 + $0xb8] sm:$0xff] %v439_v23  ;;  %v443_v25 = vld [vmem:[%s2901_s30 + $0xd8] sm:$0xff]  ;;  %v445_v26 = vld [vmem:[%s2901_s30 + $0xe0] sm:$0xff] }
  0x22   : >> { %442 = vst [vmem:[%s2903_s5 + $0xc0] sm:$0xff] %v441_v24  ;;  %444 = vst [vmem:[%s2903_s5 + $0xc8] sm:$0xff] %v443_v25  ;;  %v447_v27 = vld [vmem:[%s2901_s30 + $0xe8] sm:$0xff]  ;;  %v449_v28 = vld [vmem:[%s2901_s30 + $0xf0] sm:$0xff] }
  0x23   : >> { %446 = vst [vmem:[%s2903_s5 + $0xd0] sm:$0xff] %v445_v26  ;;  %v451_v29 = vld [vmem:[%s2901_s30 + $0xf8] sm:$0xff]  ;;  %448 = vst [vmem:[%s2903_s5 + $0xd8] sm:$0xff] %v447_v27  ;;  %v453_v30 = vld [vmem:[%s2901_s30 + $0x100] sm:$0xff] }
  0x24   : >> { %450 = vst [vmem:[%s2903_s5 + $0xe0] sm:$0xff] %v449_v28  ;;  %452 = vst [vmem:[%s2903_s5 + $0xe8] sm:$0xff] %v451_v29  ;;  %v455_v31 = vld [vmem:[%s2901_s30 + $0x108] sm:$0xff]  ;;  %v457_v32 = vld [vmem:[%s2901_s30 + $0x120] sm:$0xff] }
  0x25   : >> { %454 = vst [vmem:[%s2903_s5 + $0xf0] sm:$0xff] %v453_v30  ;;  %456 = vst [vmem:[%s2903_s5 + $0xf8] sm:$0xff] %v455_v31  ;;  %v459_v33 = vld [vmem:[%s2901_s30 + $0x128] sm:$0xff]  ;;  %v461_v34 = vld [vmem:[%s2901_s30 + $0x130] sm:$0xff] }
  0x26   : >> { %458 = vst [vmem:[%s2903_s5 + $0x100] sm:$0xff] %v457_v32  ;;  %v463_v35 = vld [vmem:[%s2901_s30 + $0x138] sm:$0xff]  ;;  %460 = vst [vmem:[%s2903_s5 + $0x108] sm:$0xff] %v459_v33  ;;  %v465_v36 = vld [vmem:[%s2901_s30 + $0x140] sm:$0xff] }
  0x27   : >> { %462 = vst [vmem:[%s2903_s5 + $0x110] sm:$0xff] %v461_v34  ;;  %464 = vst [vmem:[%s2903_s5 + $0x118] sm:$0xff] %v463_v35  ;;  %v467_v37 = vld [vmem:[%s2901_s30 + $0x148] sm:$0xff]  ;;  %v469_v38 = vld [vmem:[%s2901_s30 + $0x150] sm:$0xff] }
  0x28   : >> { %466 = vst [vmem:[%s2903_s5 + $0x120] sm:$0xff] %v465_v36  ;;  %468 = vst [vmem:[%s2903_s5 + $0x128] sm:$0xff] %v467_v37  ;;  %v471_v39 = vld [vmem:[%s2901_s30 + $0x158] sm:$0xff]  ;;  %v473_v40 = vld [vmem:[%s2901_s30 + $0x160] sm:$0xff] }
  0x29   : >> { %470 = vst [vmem:[%s2903_s5 + $0x130] sm:$0xff] %v469_v38  ;;  %v475_v41 = vld [vmem:[%s2901_s30 + $0x168] sm:$0xff]  ;;  %472 = vst [vmem:[%s2903_s5 + $0x138] sm:$0xff] %v471_v39  ;;  %v477_v42 = vld [vmem:[%s2901_s30 + $0x170] sm:$0xff] }
  0x2a   : >> { %474 = vst [vmem:[%s2903_s5 + $0x140] sm:$0xff] %v473_v40  ;;  %476 = vst [vmem:[%s2903_s5 + $0x148] sm:$0xff] %v475_v41  ;;  %v479_v43 = vld [vmem:[%s2901_s30 + $0x178] sm:$0xff]  ;;  %v481_v44 = vld [vmem:[%s2901_s30 + $0x180] sm:$0xff] }
  0x2b   : >> { %478 = vst [vmem:[%s2903_s5 + $0x150] sm:$0xff] %v477_v42  ;;  %480 = vst [vmem:[%s2903_s5 + $0x158] sm:$0xff] %v479_v43  ;;  %v483_v45 = vld [vmem:[%s2901_s30 + $0x188] sm:$0xff]  ;;  %v485_v46 = vld [vmem:[%s2901_s30 + $0x190] sm:$0xff] }
  0x2c   : >> { %482 = vst [vmem:[%s2903_s5 + $0x160] sm:$0xff] %v481_v44  ;;  %v487_v47 = vld [vmem:[%s2901_s30 + $0x198] sm:$0xff]  ;;  %484 = vst [vmem:[%s2903_s5 + $0x168] sm:$0xff] %v483_v45  ;;  %v489_v48 = vld [vmem:[%s2901_s30 + $0x1b0] sm:$0xff] }
  0x2d   : >> { %486 = vst [vmem:[%s2903_s5 + $0x170] sm:$0xff] %v485_v46  ;;  %488 = vst [vmem:[%s2903_s5 + $0x178] sm:$0xff] %v487_v47  ;;  %v491_v49 = vld [vmem:[%s2901_s30 + $0x1b8] sm:$0xff]  ;;  %v493_v50 = vld [vmem:[%s2901_s30 + $0x1c0] sm:$0xff] }
  0x2e   : >> { %490 = vst [vmem:[%s2903_s5 + $0x180] sm:$0xff] %v489_v48  ;;  %492 = vst [vmem:[%s2903_s5 + $0x188] sm:$0xff] %v491_v49  ;;  %v495_v51 = vld [vmem:[%s2901_s30 + $0x1c8] sm:$0xff]  ;;  %v497_v52 = vld [vmem:[%s2901_s30 + $0x1d0] sm:$0xff] }
  0x2f   : >> { %494 = vst [vmem:[%s2903_s5 + $0x190] sm:$0xff] %v493_v50  ;;  %v499_v53 = vld [vmem:[%s2901_s30 + $0x1d8] sm:$0xff]  ;;  %496 = vst [vmem:[%s2903_s5 + $0x198] sm:$0xff] %v495_v51  ;;  %v501_v54 = vld [vmem:[%s2901_s30 + $0x1e0] sm:$0xff]  ;;  %389 = sbr.rel (!%p386_p6) target bundleno = 21 (0x15), region = 189 }
  0x30   : >> { %498 = vst [vmem:[%s2903_s5 + $0x1a0] sm:$0xff] %v497_v52  ;;  %500 = vst [vmem:[%s2903_s5 + $0x1a8] sm:$0xff] %v499_v53  ;;  %v503_v55 = vld [vmem:[%s2901_s30 + $0x1e8] sm:$0xff]  ;;  %v505_v56 = vld [vmem:[%s2901_s30 + $0x1f0] sm:$0xff] }
  0x31   : >> { %502 = vst [vmem:[%s2903_s5 + $0x1b0] sm:$0xff] %v501_v54  ;;  %504 = vst [vmem:[%s2903_s5 + $0x1b8] sm:$0xff] %v503_v55  ;;  %v507_v57 = vld [vmem:[%s2901_s30 + $0x1f8] sm:$0xff]  ;;  %v509_v58 = vld [vmem:[%s2901_s30 + $0x200] sm:$0xff] }
  0x32   : >> { %506 = vst [vmem:[%s2903_s5 + $0x1c0] sm:$0xff] %v505_v56  ;;  %v511_v59 = vld [vmem:[%s2901_s30 + $0x208] sm:$0xff]  ;;  %508 = vst [vmem:[%s2903_s5 + $0x1c8] sm:$0xff] %v507_v57  ;;  %v513_v60 = vld [vmem:[%s2901_s30 + $0x210] sm:$0xff] }
  0x33   : >> { %510 = vst [vmem:[%s2903_s5 + $0x1d0] sm:$0xff] %v509_v58  ;;  %512 = vst [vmem:[%s2903_s5 + $0x1d8] sm:$0xff] %v511_v59  ;;  %v515_v61 = vld [vmem:[%s2901_s30 + $0x218] sm:$0xff]  ;;  %v517_v62 = vld [vmem:[%s2901_s30 + $0x220] sm:$0xff] }
  0x34   : >> { %514 = vst [vmem:[%s2903_s5 + $0x1e0] sm:$0xff] %v513_v60  ;;  %516 = vst [vmem:[%s2903_s5 + $0x1e8] sm:$0xff] %v515_v61  ;;  %v519_v63 = vld [vmem:[%s2901_s30 + $0x228] sm:$0xff] }
  0x35   : >> { %518 = vst [vmem:[%s2903_s5 + $0x1f0] sm:$0xff] %v517_v62  ;;  %520 = vst [vmem:[%s2903_s5 + $0x1f8] sm:$0xff] %v519_v63 }
  0x36 PF: > { %564 = sbr.rel (!%p2883_p3) target bundleno = 61 (0x3d), region = 80  ;;  %s566_s7 = sand.u32 (%p2883_p3), 1, %s2809_s16  }
  0x37   : > { %s2257_s8 = smul.u32 (%p2883_p3), 576, %s2817_s18  ;;  %s2256_s9 = sshll.u32 (%p2883_p3), %s566_s7, 5 }
  0x38   : > { %s568_s13 = scalar_lea.vmem (%p2883_p3), [#allocation3], %s2256_s9 }
  0x39   : > { %s2149_s12 = scalar_lea.vmem (%p2883_p3), %s3331_s1, %s2257_s8 }
  0x3a   : > { %v2258_v0 = vld [vmem:[%s2149_s12 + $0x80] sm:$0xff] (%p2883_p3)  ;;  %v2259_v1 = vld [vmem:[%s2149_s12 + $0x88] sm:$0xff] (%p2883_p3)  ;;  %v2260_v2 = vld [vmem:[%s2149_s12 + $0x110] sm:$0xff] (%p2883_p3) }
  0x3b   : > { %610 = vst [vmem:[%s568_s13] sm:$0xff] (%p2883_p3), %v2258_v0  ;;  %612 = vst [vmem:[%s568_s13 + $0x8] sm:$0xff] (%p2883_p3), %v2259_v1  ;;  %v2261_v3 = vld [vmem:[%s2149_s12 + $0x118] sm:$0xff] (%p2883_p3) }
  0x3c   : > { %614 = vst [vmem:[%s568_s13 + $0x10] sm:$0xff] (%p2883_p3), %v2260_v2  ;;  %616 = vst [vmem:[%s568_s13 + $0x18] sm:$0xff] (%p2883_p3), %v2261_v3 }
  0x3d PF: > { %p2262_p7 = scmp.ge.s32.totalorder %s2821_s19, 1  ;;  %p621_p8 = scmp.lt.s32.totalorder %s2821_s19, 3 }
  0x3f   : > { %p622_p9 = pnand %p2262_p7, %p621_p8 }
  0x40   : > { %v695_v4 = vld [vmem:[%s3332_s2] sm:$0xf] (!%p622_p9)  ;;  %vm721_vm0 = vcmask (!%p622_p9), 1043456   ;;  %v3056_v5 = vld [vmem:[%s3332_s2 + $0x10] sm:$0xf] (!%p622_p9)  ;;  %s628_s25 = sand.u32 (!%p622_p9), 1, %s2805_s15  }
  0x41   : > { %625 = sbr.rel (%p622_p9) target bundleno = 355 (0x163), region = 118  ;;  %2494 = vmatprep.subr.msk.mxu1 (!%p622_p9), %vm721_vm0, %v695_v4  ;;  %2550 = vmatprep.subr.msk.mxu0 (!%p622_p9), %vm721_vm0, %v3056_v5  ;;  %s2263_s26 = sshll.u32 (!%p622_p9), %s628_s25, 9  ;;  %vm696_vm1 = vcmask (!%p622_p9), 31744   ;;  %v2285_v6 = vld [vmem:[%s3332_s2 + $0x4] sm:$0xf] (!%p622_p9)  ;;  %vm1914_vm2 = vcmask (!%p622_p9), 1046528  }
  0x42   : > { %v2349_v7 = vld [vmem:[%s3332_s2 + $0x14] sm:$0xf] (!%p622_p9)  ;;  %2495 = vmatpush3.msk.msra.mxu1 (!%p622_p9), %vm721_vm0, %v695_v4  ;;  %2551 = vmatpush3.msk.msra.mxu0 (!%p622_p9), %vm721_vm0, %v3056_v5  ;;  %s3073_s5 = scalar_lea.vmem (!%p622_p9), [#allocation2], %s2263_s26  ;;  %v2380_v14 = vld [vmem:[%s3332_s2 + $0x18] sm:$0xf] (!%p622_p9)  ;;  %s2264_s22 = sshll.u32 (!%p622_p9), %s628_s25, 5 }
  0x43   : > { %v687_v8 = vld [vmem:[%s3073_s5] sm:$0xff] (!%p622_p9)  ;;  %2508 = vmatprep.subr.msk.mxu1 (!%p622_p9), %vm721_vm0, %v2285_v6  ;;  %v3079_v10 = vld [vmem:[%s3073_s5 + $0x10] sm:$0xff] (!%p622_p9)  ;;  %2564 = vmatprep.subr.msk.mxu0 (!%p622_p9), %vm721_vm0, %v2349_v7  ;;  %v2295_v15 = vld [vmem:[%s3332_s2 + $0x8] sm:$0xf] (!%p622_p9)  ;;  %s3201_s15 = scalar_lea.vmem (!%p622_p9), [#allocation3], %s2264_s22  ;;  %p677_p10 = scmp.lt.s32.totalorder (!%p622_p9), %s2813_s17, 1 }
  0x44   : > { %v2323_v9 = vld [vmem:[%s3073_s5 + $0x180] sm:$0xff] (!%p622_p9)  ;;  %2496 = vmatprep.mubr.msk.f32.mxu1 (!%p622_p9), %vm696_vm1, %v687_v8  ;;  %v2324_v11 = vld [vmem:[%s3073_s5 + $0x190] sm:$0xff] (!%p622_p9)  ;;  %v2390_v24 = vld [vmem:[%s3332_s2 + $0x1c] sm:$0xf] (!%p622_p9)  ;;  %v1915_v53 = vrot.slane (!%p622_p9), %v3079_v10, 1 }
  0x45   : > { %2552 = vmatprep.mubr.msk.f32.mxu0 (!%p622_p9), %vm696_vm1, %v2323_v9  ;;  %v3086_v12 = vld [vmem:[%s3073_s5 + $0x20] sm:$0xff] (!%p622_p9)  ;;  %2497 = vmatmul.mubr.msk.f32.vlgmr.msra.gmra.mrb[0].mxu1 (!%p622_p9), %vm696_vm1, %v3079_v10  ;;  %v3101_v16 = vld [vmem:[%s3073_s5 + $0x30] sm:$0xff] (!%p622_p9)  ;;  %v2313_v33 = vld [vmem:[%s3332_s2 + $0xc] sm:$0xf] (!%p622_p9) }
  0x46   : > { %v2325_v13 = vld [vmem:[%s3073_s5 + $0x1a0] sm:$0xff] (!%p622_p9)  ;;  %2553 = vmatmul.mubr.msk.f32.vlgmr.msra.gmra.mrb[0].mxu0 (!%p622_p9), %vm696_vm1, %v2324_v11  ;;  %2509 = vmatpush3.msk.msra.mxu1 (!%p622_p9), %vm721_vm0, %v2285_v6  ;;  %v2326_v17 = vld [vmem:[%s3073_s5 + $0x1b0] sm:$0xff] (!%p622_p9)  ;;  %v2360_v51 = vld [vmem:[%s3073_s5 + $0x18] sm:$0x1] (!%p622_p9)  ;;  %v1918_v58 = vrot.slane (!%p622_p9), %v3086_v12, 1  ;;  %v1921_v62 = vrot.slane (!%p622_p9), %v3101_v16, 1 }
  0x47   : > { %2565 = vmatpush3.msk.msra.mxu0 (!%p622_p9), %vm721_vm0, %v2349_v7  ;;  %2499 = vmatprep.mubr.msk.f32.mxu1 (!%p622_p9), %vm696_vm1, %v3086_v12  ;;  %v3108_v18 = vld [vmem:[%s3073_s5 + $0x40] sm:$0xff] (!%p622_p9)  ;;  %v3120_v20 = vld [vmem:[%s3073_s5 + $0x50] sm:$0xff] (!%p622_p9)  ;;  %v1916_v55 = vrot.slane (!%p622_p9), %v2360_v51, 1  ;;  %v2362_v56 = vld [vmem:[%s3073_s5 + $0x28] sm:$0x1] (!%p622_p9) }
  0x48   : > { %2555 = vmatprep.mubr.msk.f32.mxu0 %vm696_vm1, %v2325_v13  ;;  %v2341_v19 = vld [vmem:[%s3073_s5 + $0x101] sm:$0xff]  ;;  %2578 = vmatprep.subr.msk.mxu0 %vm721_vm0, %v2380_v14  ;;  %v2342_v21 = vld [vmem:[%s3073_s5 + $0x111] sm:$0xff]  ;;  %v1919_v61 = vrot.slane %v2362_v56, 1  ;;  %v1924_v4 = vrot.slane %v3108_v18, 1  ;;  %v1927_v8 = vrot.slane %v3120_v20, 1  ;;  %s3343_s17 = smov (!%p677_p10, %s2813_s17), 1 }
  0x49   : > { %2522 = vmatprep.subr.msk.mxu1 %vm721_vm0, %v2295_v15  ;;  %2500 = vmatmul.mubr.msk.f32.gmra.mrb[2].mxu1 %vm696_vm1, %v3101_v16  ;;  %v3124_v22 = vld [vmem:[%s3073_s5 + $0x60] sm:$0xff]  ;;  %v3137_v25 = vld [vmem:[%s3073_s5 + $0x70] sm:$0xff]  ;;  %v2364_v57 = vld [vmem:[%s3073_s5 + $0x38] sm:$0x1]  ;;  %v1917_v0 = vsel %vm1914_vm2, %v1915_v53, %v1916_v55  ;;  %s2412_s26 = sshll.u32 %s3343_s17, 6 }
  0x4a   : > { %2556 = vmatmul.mubr.msk.f32.gmra.mrb[2].mxu0 %vm696_vm1, %v2326_v17  ;;  %2502 = vmatprep.mubr.msk.f32.mxu1 %vm696_vm1, %v3108_v18  ;;  %v2343_v23 = vld [vmem:[%s3073_s5 + $0x121] sm:$0xff]  ;;  %v2344_v26 = vld [vmem:[%s3073_s5 + $0x131] sm:$0xff]  ;;  %v1922_v1 = vrot.slane %v2364_v57, 1  ;;  %v1920_v6 = vsel %vm1914_vm2, %v1918_v58, %v1919_v61  ;;  %s3297_s29 = scalar_lea.vmem %s3334_s4, %s2412_s26 }
  0x4b   : > { %2566 = vmatprep.mubr.msk.f32.mxu0 %vm696_vm1, %v2341_v19  ;;  %v2277_v27 = vld [vmem:[%s3073_s5 + $0x80] sm:$0xff]  ;;  %v2278_v29 = vld [vmem:[%s3073_s5 + $0x90] sm:$0xff]  ;;  %v2366_v2 = vld [vmem:[%s3073_s5 + $0x48] sm:$0x1] }
  0x4c   : > { %v2345_v28 = vld [vmem:[%s3073_s5 + $0x141] sm:$0xff]  ;;  %v2346_v30 = vld [vmem:[%s3073_s5 + $0x151] sm:$0xff]  ;;  %v1925_v7 = vrot.slane %v2366_v2, 1 }
  0x4d   : > { %2503 = vmatmul.mubr.msk.f32.gmra.mrb[4].mxu1 %vm696_vm1, %v3120_v20  ;;  %v2279_v31 = vld [vmem:[%s3073_s5 + $0xa0] sm:$0xff]  ;;  %v2280_v34 = vld [vmem:[%s3073_s5 + $0xb0] sm:$0xff]  ;;  %v2368_v3 = vld [vmem:[%s3073_s5 + $0x58] sm:$0x1] }
  0x4e   : > { %2567 = vmatmul.mubr.msk.f32.vlgmr.msra.gmra.mrb[0].mxu0 %vm696_vm1, %v2342_v21  ;;  %2505 = vmatprep.mubr.msk.f32.mxu1 %vm696_vm1, %v3124_v22  ;;  %v2347_v32 = vld [vmem:[%s3073_s5 + $0x161] sm:$0xff]  ;;  %v2348_v35 = vld [vmem:[%s3073_s5 + $0x171] sm:$0xff]  ;;  %v1928_v11 = vrot.slane %v2368_v3, 1 }
  0x4f   : > { %2579 = vmatpush3.msk.msra.mxu0 %vm721_vm0, %v2380_v14  ;;  %2569 = vmatprep.mubr.msk.f32.mxu0 %vm696_vm1, %v2343_v23  ;;  %v2281_v36 = vld [vmem:[%s3073_s5 + $0xc0] sm:$0xff]  ;;  %v2282_v37 = vld [vmem:[%s3073_s5 + $0xd0] sm:$0xff]  ;;  %v2372_v13 = vld [vmem:[%s3073_s5 + $0x78] sm:$0x1]  ;;  %v1930_v14 = vrot.slane %v3124_v22, 1 }
  0x50   : > { %2592 = vmatprep.subr.msk.mxu0 %vm721_vm0, %v2390_v24  ;;  %v2283_v38 = vld [vmem:[%s3073_s5 + $0xe0] sm:$0xff]  ;;  %v2284_v40 = vld [vmem:[%s3073_s5 + $0xf0] sm:$0xff]  ;;  %v1620_v19 = vld [vmem:[%s3201_s15 + $0x8] sm:$0x1]  ;;  %v1929_v21 = vsel %vm1914_vm2, %v1927_v8, %v1928_v11  ;;  %v1934_v23 = vrot.slane %v2372_v13, 1 }
  0x51   : > { %2506 = vmatmul.mubr.msk.f32.gmra.mrb[6].mxu1 %vm696_vm1, %v3137_v25  ;;  %v2400_v39 = vld [vmem:[%s3332_s2 + $0x20] sm:$0xf]  ;;  %v996_v42 = vld [vmem:[%s3073_s5 + $0x11] sm:$0xff] }
  0x52   : > { %2570 = vmatmul.mubr.msk.f32.gmra.mrb[2].mxu0 %vm696_vm1, %v2344_v26  ;;  %2510 = vmatprep.mubr.msk.f32.mxu1 %vm696_vm1, %v2277_v27  ;;  %v995_v41 = vld [vmem:[%s3073_s5 + $0x1] sm:$0xff]  ;;  %v998_v44 = vld [vmem:[%s3073_s5 + $0x31] sm:$0xff]  ;;  %v1937_v26 = vrot.slane %v1620_v19, 1 }
  0x53   : > { %2572 = vmatprep.mubr.msk.f32.mxu0 %vm696_vm1, %v2345_v28  ;;  %v997_v43 = vld [vmem:[%s3073_s5 + $0x21] sm:$0xff]  ;;  %v1000_v47 = vld [vmem:[%s3073_s5 + $0x51] sm:$0xff] }
  0x54   : > { %v3204_v45 = vld [vmem:[%s3201_s15] sm:$0xff]  ;;  %v1002_v49 = vld [vmem:[%s3073_s5 + $0x71] sm:$0xff] }
  0x55   : > { %2511 = vmatmul.mubr.msk.f32.vlgmr.msra.gmra.mrb[0].mxu1 %vm696_vm1, %v2278_v29  ;;  %v999_v46 = vld [vmem:[%s3073_s5 + $0x41] sm:$0xff]  ;;  %v2306_v52 = vld [vmem:[%s3073_s5 + $0x110] sm:$0xff] }
  0x56   : > { %2573 = vmatmul.mubr.msk.f32.gmra.mrb[4].mxu0 %vm696_vm1, %v2346_v30  ;;  %2523 = vmatpush3.msk.msra.mxu1 %vm721_vm0, %v2295_v15  ;;  %v1001_v48 = vld [vmem:[%s3073_s5 + $0x61] sm:$0xff]  ;;  %v2308_v59 = vld [vmem:[%s3073_s5 + $0x130] sm:$0xff] }
  0x57   : > { %2513 = vmatprep.mubr.msk.f32.mxu1 %vm696_vm1, %v2279_v31  ;;  %2575 = vmatprep.mubr.msk.f32.mxu0 %vm696_vm1, %v2347_v32  ;;  %v2305_v50 = vld [vmem:[%s3073_s5 + $0x100] sm:$0xff]  ;;  %v1621_v60 = vld [vmem:[%s3201_s15 + $0x10] sm:$0xff] }
  0x58   : > { %2536 = vmatprep.subr.msk.mxu1 %vm721_vm0, %v2313_v33  ;;  %v2307_v54 = vld [vmem:[%s3073_s5 + $0x120] sm:$0xff]  ;;  %v2312_v15 = vld [vmem:[%s3073_s5 + $0x170] sm:$0xff] }
  0x59   : > { %2514 = vmatmul.mubr.msk.f32.gmra.mrb[2].mxu1 %vm696_vm1, %v2280_v34  ;;  %v2309_v63 = vld [vmem:[%s3073_s5 + $0x140] sm:$0xff] }
  0x5a   : > { %2576 = vmatmul.mubr.msk.f32.gmra.mrb[6].mxu0 %vm696_vm1, %v2348_v35  ;;  %2516 = vmatprep.mubr.msk.f32.mxu1 %vm696_vm1, %v2281_v36  ;;  %v2311_v9 = vld [vmem:[%s3073_s5 + $0x160] sm:$0xff] }
  0x5b   : > { %2580 = vmatprep.mubr.msk.f32.mxu0 %vm696_vm1, %v3079_v10  ;;  %v1923_v10 = vsel %vm1914_vm2, %v1921_v62, %v1922_v1  ;;  %v2329_v27 = vld [vmem:[%s3073_s5 + $0x1e0] sm:$0xff] }
  0x5d   : > { %2517 = vmatmul.mubr.msk.f32.gmra.mrb[4].mxu1 %vm696_vm1, %v2282_v37 }
  0x5e   : > { %2581 = vmatmul.mubr.msk.f32.vlgmr.msra.gmra.mrb[0].mxu0 %vm696_vm1, %v3086_v12  ;;  %2519 = vmatprep.mubr.msk.f32.mxu1 %vm696_vm1, %v2283_v38  ;;  %v2370_v12 = vld [vmem:[%s3073_s5 + $0x68] sm:$0x1] }
  0x5f   : > { %2593 = vmatpush3.msk.msra.mxu0 %vm721_vm0, %v2390_v24  ;;  %2583 = vmatprep.mubr.msk.f32.mxu0 %vm696_vm1, %v3101_v16  ;;  %v1926_v16 = vsel %vm1914_vm2, %v1924_v4, %v1925_v7  ;;  %v1931_v17 = vrot.slane %v2370_v12, 1  ;;  %v2328_v24 = vld [vmem:[%s3073_s5 + $0x1d0] sm:$0xff] }
  0x60   : > { %2606 = vmatprep.subr.msk.mxu0 %vm721_vm0, %v2400_v39 }
  0x61   : > { %2520 = vmatmul.mubr.msk.f32.gmra.mrb[6].mxu1 %vm696_vm1, %v2284_v40 }
  0x62   : > { %2584 = vmatmul.mubr.msk.f32.gmra.mrb[2].mxu0 %vm696_vm1, %v3108_v18  ;;  %2524 = vmatprep.mubr.msk.f32.mxu1 %vm696_vm1, %v995_v41  ;;  %v1933_v18 = vrot.slane %v3137_v25, 1 }
  0x63   : > { %2586 = vmatprep.mubr.msk.f32.mxu0 %vm696_vm1, %v3120_v20  ;;  %v2327_v20 = vld [vmem:[%s3073_s5 + $0x1c0] sm:$0xff] }
  0x64   : > { %v1935_v28 = vsel %vm1914_vm2, %v1933_v18, %v1934_v23 }
  0x65   : > { %2525 = vmatmul.mubr.msk.f32.vlgmr.msra.gmra.mrb[0].mxu1 %vm696_vm1, %v996_v42 }
  0x66   : > { %2587 = vmatmul.mubr.msk.f32.gmra.mrb[4].mxu0 %vm696_vm1, %v3124_v22  ;;  %2537 = vmatpush3.msk.msra.mxu1 %vm721_vm0, %v2313_v33  ;;  %v1936_v22 = vrot.slane %v3204_v45, 1  ;;  %v2276_v33 = vld [vmem:[%s3333_s3] ss:$0 sm:$0xff] }
  0x67   : > { %2527 = vmatprep.mubr.msk.f32.mxu1 %vm696_vm1, %v997_v43  ;;  %2589 = vmatprep.mubr.msk.f32.mxu0 %vm696_vm1, %v3137_v25  ;;  %v1932_v25 = vsel %vm1914_vm2, %v1930_v14, %v1931_v17 }
  0x68   : > { %2620 = vmatprep.subr.msk.mxu1 %vm721_vm0, %v3056_v5  ;;  %v1938_v30 = vsel %vm1914_vm2, %v1936_v22, %v1937_v26 }
  0x69   : > { %2528 = vmatmul.mubr.msk.f32.gmra.mrb[2].mxu1 %vm696_vm1, %v998_v44 }
  0x6a   : > { %2590 = vmatmul.mubr.msk.f32.gmra.mrb[6].mxu0 %vm696_vm1, %v3204_v45  ;;  %2530 = vmatprep.mubr.msk.f32.mxu1 %vm696_vm1, %v999_v46 }
  0x6b   : > { %2594 = vmatprep.mubr.msk.f32.mxu0 %vm696_vm1, %v2278_v29  ;;  %v2330_v29 = vld [vmem:[%s3073_s5 + $0x1f0] sm:$0xff] }
  0x6d   : > { %2531 = vmatmul.mubr.msk.f32.gmra.mrb[4].mxu1 %vm696_vm1, %v1000_v47 }
  0x6e   : > { %2595 = vmatmul.mubr.msk.f32.vlgmr.msra.gmra.mrb[0].mxu0 %vm696_vm1, %v2279_v31  ;;  %2533 = vmatprep.mubr.msk.f32.mxu1 %vm696_vm1, %v1001_v48 }
  0x6f   : > { %2607 = vmatpush3.msk.msra.mxu0 %vm721_vm0, %v2400_v39  ;;  %2597 = vmatprep.mubr.msk.f32.mxu0 %vm696_vm1, %v2280_v34 }
  0x71   : > { %2534 = vmatmul.mubr.msk.f32.gmra.mrb[6].mxu1 %vm696_vm1, %v1002_v49 }
  0x72   : > { %2598 = vmatmul.mubr.msk.f32.gmra.mrb[2].mxu0 %vm696_vm1, %v2281_v36  ;;  %2538 = vmatprep.mubr.msk.f32.mxu1 %vm696_vm1, %v2305_v50 }
  0x73   : > { %2600 = vmatprep.mubr.msk.f32.mxu0 %vm696_vm1, %v2282_v37 }
  0x75   : > { %2539 = vmatmul.mubr.msk.f32.vlgmr.msra.gmra.mrb[0].mxu1 %vm696_vm1, %v2306_v52 }
  0x76   : > { %2601 = vmatmul.mubr.msk.f32.gmra.mrb[4].mxu0 %vm696_vm1, %v2283_v38  ;;  %2621 = vmatpush3.msk.msra.mxu1 %vm721_vm0, %v3056_v5  ;;  %v2310_v5 = vld [vmem:[%s3073_s5 + $0x150] sm:$0xff] }
  0x77   : > { %2541 = vmatprep.mubr.msk.f32.mxu1 %vm696_vm1, %v2307_v54  ;;  %2603 = vmatprep.mubr.msk.f32.mxu0 %vm696_vm1, %v2284_v40 }
  0x79   : > { %2542 = vmatmul.mubr.msk.f32.gmra.mrb[2].mxu1 %vm696_vm1, %v2308_v59 }
  0x7a   : > { %2604 = vmatmul.mubr.msk.f32.gmra.mrb[6].mxu0 %vm696_vm1, %v1621_v60  ;;  %2544 = vmatprep.mubr.msk.f32.mxu1 %vm696_vm1, %v2309_v63 }
  0x7b   : > { %2608 = vmatprep.mubr.msk.f32.mxu0 %vm696_vm1, %v1917_v0 }
  0x7d   : > { %2545 = vmatmul.mubr.msk.f32.gmra.mrb[4].mxu1 %vm696_vm1, %v2310_v5 }
  0x7e   : > { %2609 = vmatmul.mubr.msk.f32.vlgmr.msra.gmra.mrb[0].mxu0 %vm696_vm1, %v1920_v6  ;;  %2547 = vmatprep.mubr.msk.f32.mxu1 %vm696_vm1, %v2311_v9 }
  0x7f   : > { %2611 = vmatprep.mubr.msk.f32.mxu0 %vm696_vm1, %v1923_v10 }
  0x81   : > { %2548 = vmatmul.mubr.msk.f32.gmra.mrb[6].mxu1 %vm696_vm1, %v2312_v15 }
  0x82   : > { %2612 = vmatmul.mubr.msk.f32.gmra.mrb[2].mxu0 %vm696_vm1, %v1926_v16  ;;  %2558 = vmatprep.mubr.msk.f32.mxu1 %vm696_vm1, %v2327_v20 }
  0x83   : > { %2614 = vmatprep.mubr.msk.f32.mxu0 %vm696_vm1, %v1929_v21 }
  0x85   : > { %2559 = vmatmul.mubr.msk.f32.vlgmr.msra.gmra.mrb[4].mxu1 %vm696_vm1, %v2328_v24 }
  0x86   : > { %2615 = vmatmul.mubr.msk.f32.gmra.mrb[4].mxu0 %vm696_vm1, %v1932_v25  ;;  %2561 = vmatprep.mubr.msk.f32.mxu1 %vm696_vm1, %v2329_v27 }
  0x87   : > { %2617 = vmatprep.mubr.msk.f32.mxu0 %vm696_vm1, %v1935_v28 }
  0x89   : > { %2562 = vmatmul.mubr.msk.f32.gmra.mrb[6].mxu1 %vm696_vm1, %v2330_v29 }
  0x8a   : > { %2618 = vmatmul.mubr.msk.f32.gmra.mrb[6].mxu0 %vm696_vm1, %v1938_v30 }
 0x148   : > { %v2540_v31 = vpop.f32.mrb[0].mxu1 }
 0x149   : > { %v1249_v32 = vpop.f32.mrb[1].mxu1  ;;  %v2622_v36 = vadd.f32 %v2540_v31, %v2276_v33 }
 0x14a   : > { %v2624_v37 = vadd.f32 %v2276_v33, %v1249_v32 }
 0x14c   : > { %v2543_v34 = vpop.f32.mrb[2].mxu1 }
 0x14d   : > { %v1259_v35 = vpop.f32.mrb[3].mxu1  ;;  %v2626_v42 = vadd.f32 %v2543_v34, %v2276_v33 }
 0x14e   : > { %v2628_v43 = vadd.f32 %v2276_v33, %v1259_v35 }
 0x151   : > { %v2610_v38 = vpop.f32.mrb[0].mxu0 }
 0x152   : > { %v2623_v39 = vadd.f32 %v2622_v36, %v2610_v38  ;;  %v2026_v40 = vpop.f32.mrb[1].mxu0 }
 0x153   : > { %v2625_v41 = vadd.f32 %v2624_v37, %v2026_v40 }
 0x154   : > { %2074 = vst.msk [vmem:[%s3297_s29 + $0x8] sm:$0xff] %vm696_vm1, %v2623_v39 }
 0x155   : > { %2073 = vst.msk [vmem:[%s3297_s29] sm:$0xff] %vm696_vm1, %v2625_v41  ;;  %v2613_v44 = vpop.f32.mrb[2].mxu0 }
 0x156   : > { %v2627_v45 = vadd.f32 %v2626_v42, %v2613_v44  ;;  %v2036_v46 = vpop.f32.mrb[3].mxu0 }
 0x157   : > { %v2629_v47 = vadd.f32 %v2628_v43, %v2036_v46 }
 0x158   : > { %2076 = vst.msk [vmem:[%s3297_s29 + $0x18] sm:$0xff] %vm696_vm1, %v2627_v45  ;;  %v2560_v48 = vpop.f32.mrb[4].mxu1 }
 0x159   : > { %2075 = vst.msk [vmem:[%s3297_s29 + $0x10] sm:$0xff] %vm696_vm1, %v2629_v47  ;;  %v2616_v49 = vpop.f32.mrb[4].mxu0  ;;  %v2630_v50 = vadd.f32 %v2560_v48, %v2276_v33  ;;  %v1420_v51 = vpop.f32.mrb[5].mxu1 }
 0x15a   : > { %v2046_v52 = vpop.f32.mrb[5].mxu0  ;;  %v2632_v53 = vadd.f32 %v2276_v33, %v1420_v51 }
 0x15b   : > { %v2631_v54 = vadd.f32 %v2630_v50, %v2616_v49 }
 0x15c   : > { %v2633_v55 = vadd.f32 %v2632_v53, %v2046_v52  ;;  %v2563_v56 = vpop.f32.mrb[6].mxu1 }
 0x15d   : > { %v2619_v57 = vpop.f32.mrb[6].mxu0  ;;  %2078 = vst.msk [vmem:[%s3297_s29 + $0x28] sm:$0xff] %vm696_vm1, %v2631_v54  ;;  %v2634_v58 = vadd.f32 %v2563_v56, %v2276_v33  ;;  %v1430_v59 = vpop.f32.mrb[7].mxu1 }
 0x15e   : > { %v2056_v60 = vpop.f32.mrb[7].mxu0  ;;  %2077 = vst.msk [vmem:[%s3297_s29 + $0x20] sm:$0xff] %vm696_vm1, %v2633_v55  ;;  %v2636_v61 = vadd.f32 %v2276_v33, %v1430_v59 }
 0x15f   : > { %v2635_v62 = vadd.f32 %v2634_v58, %v2619_v57 }
 0x160   : > { %v2637_v63 = vadd.f32 %v2636_v61, %v2056_v60 }
 0x161   : > { %2080 = vst.msk [vmem:[%s3297_s29 + $0x38] sm:$0xff] %vm696_vm1, %v2635_v62 }
 0x162   : > { %2079 = vst.msk [vmem:[%s3297_s29 + $0x30] sm:$0xff] %vm696_vm1, %v2637_v63 }
 0x163 PF: > { %s14_s19 = sadd.s32 1, %s2821_s19   ;;  %s3336_s15 = smov %s2809_s16 }
 0x164   : > { %p11_p11 = scmp.ge.s32.totalorder %s14_s19, 4   ;;  %s3337_s16 = smov %s2891_s24 }
 0x165   : > { %s3338_s17 = smov %s2817_s18  ;;  %s3339_s18 = smov %s3341_s20 }
 0x166   :  { %13 = sbr.rel (!%p11_p11) target bundleno = 3 (0x3), region = 211 }

</bundles_post_ra>
